<compile_context>
chip_gen: v6e
topology: v6e:2x2x1
jax: 0.10.0
libtpu: 0.0.40
codegen_flags: <defaults>
</compile_context>

<pallas_src>
import functools

import jax
import jax.numpy as jnp
from jax.experimental import pallas as pl
from jax.experimental.pallas import tpu as pltpu


# ------------------------------ spec helpers ------------------------------

def _full_spec(shape):
    """Whole-array block; same block index at every grid step (fetched once)."""
    zeros = (0,) * len(shape)
    return pl.BlockSpec(shape, lambda *_: zeros)


# Whole array resident in VMEM, no pipelining => single-buffered.
_VMEM_SPEC = pl.BlockSpec(memory_space=pltpu.MemorySpace.VMEM)


# ----------------------- kernel 1: fused GCN stack -------------------------

def _make_gcn_stack_kernel(f_outs, offsets):
    """refs = (A^T, x^T, w0^T, b0, ..., w_{L-1}^T, b_{L-1}, out_slab)."""
    num_layers = len(f_outs)

    def kernel(*refs):
        at_ref, xt_ref = refs[0], refs[1]          # A^T [N,N] bf16, x^T [F0,N]
        out_ref = refs[2 + 2 * num_layers]         # slab [D_total, N] f32

        a_t = at_ref[...]
        # deg(A + I) without materializing A+I: column-sum of A^T plus self-loop.
        deg = jnp.sum(a_t, axis=0, keepdims=True, dtype=jnp.float32) + 1.0   # [1,N]
        dinv = jax.lax.rsqrt(deg)                                            # [1,N]

        h_t = xt_ref[...]                                                    # [F,N]
        for layer in range(num_layers):
            w_t = refs[2 + 2 * layer][...]        # [F_out, F_in]
            b_t = refs[3 + 2 * layer][...]        # [F_out, 1]
            # z = D^-1/2 (h W)   (transposed layout: [F_out, N])
            z_t = dinv * jnp.dot(w_t, h_t, preferred_element_type=jnp.float32)
            # (A + I) @ z == A @ z + z  -- self-loop folded algebraically;
            # bf16 MXU operands, f32 accumulation.
            msg_t = jnp.dot(z_t.astype(a_t.dtype), a_t,
                            preferred_element_type=jnp.float32) + z_t
            h_t = jnp.tanh(dinv * msg_t + b_t)                               # [F_out,N]
            out_ref[offsets[layer]:offsets[layer] + f_outs[layer], :] = h_t

    return kernel


def gcn_stack(adj_t, x_t, gcn_params):
    """All GCN layers (+ tanh) in ONE pallas_call.

    adj_t : [N, N]  A^T (A[target, source]=1), bf16.
    x_t   : [F0, N] transposed node features, f32.
    Returns the concatenated per-layer outputs as a single [D_total, N] slab.
    """
    _, n = x_t.shape
    f_outs = [w.shape[0] for (w, _) in gcn_params]
    offsets, acc = [], 0
    for f in f_outs:
        offsets.append(acc)
        acc += f
    d_total = acc

    args = [adj_t, x_t]
    for (w, b) in gcn_params:
        args += [w, b]

    flops = 0
    for (w, _) in gcn_params:
        fo, fi = w.shape
        flops += 2 * n * fi * fo + 2 * n * n * fo + 6 * n * fo
    bytes_accessed = (adj_t.size * adj_t.dtype.itemsize
                      + 4 * (x_t.size + d_total * n)
                      + 4 * sum(w.size + b.size for (w, b) in gcn_params))

    # No grid => every operand is a single-buffered resident VMEM ref.  The
    # explicit VMEM limit keeps the default scoped limit (16/32 MiB) from
    # rejecting larger graphs well below physical capacity.
    vmem_need = (2 * adj_t.size * adj_t.dtype.itemsize
                 + 8 * (d_total + x_t.shape[0] + 16) * n * 4)
    vmem_limit = int(min(100 * 2 ** 20, max(32 * 2 ** 20, vmem_need)))

    # TODO(synk): for N >~ 2k, row/column-tile A^T (grid over node tiles, h/z in
    # persistent VMEM scratch) so the kernel also fits v7x's 64 MiB VMEM.
    return pl.pallas_call(
        _make_gcn_stack_kernel(tuple(f_outs), tuple(offsets)),
        in_specs=[_VMEM_SPEC] * len(args),
        out_specs=_VMEM_SPEC,
        out_shape=jax.ShapeDtypeStruct((d_total, n), jnp.float32),
        compiler_params=pltpu.CompilerParams(vmem_limit_bytes=vmem_limit),
        cost_estimate=pl.CostEstimate(flops=int(flops),
                                      transcendentals=int(d_total * n),
                                      bytes_accessed=int(bytes_accessed)),
    )(*args)


# --------------------- kernel 2: fused post-sort head ----------------------

def _head_kernel(xe_ref, xo_ref, w1_ref, b1_ref, w2_ref, b2_ref,
                 wl1_ref, bl1_ref, wl2_ref, bl2_ref, o_ref, *, kw2, t_len):
    g = xe_ref.shape[0]
    f32 = jnp.float32

    xe = xe_ref[...]                                          # [G, k//2, D]
    xo = xo_ref[...]
    w1b = jnp.broadcast_to(w1_ref[...], (g,) + tuple(w1_ref.shape))   # [G,16,D]

    # Conv1d(1,16,D,stride=D)+ReLU then MaxPool1d(2,2); ReLU is monotone, so
    # max(relu(a+b1), relu(b+b1)) == relu(max(a,b)+b1)  (bit-exact).
    ue = jnp.einsum('ghd,gcd->ghc', xe, w1b, preferred_element_type=f32)
    uo = jnp.einsum('ghd,gcd->ghc', xo, w1b, preferred_element_type=f32)
    pooled = jnp.maximum(jnp.maximum(ue, uo) + b1_ref[...], 0.0)      # [G,k//2,16]

    # Conv1d(16,32,5,1)+ReLU: the kw2 taps fused into ONE batched matmul
    # (shifted slices concatenated on the lane/channel axis; no im2col loop).
    lhs = jnp.concatenate(
        [pooled[:, kk:kk + t_len, :] for kk in range(kw2)], axis=-1)  # [G,T,kw2*16]
    w2b = jnp.broadcast_to(w2_ref[...], (g,) + tuple(w2_ref.shape))   # [G,32,kw2*16]
    h2 = jnp.einsum('gtc,goc->gto', lhs, w2b, preferred_element_type=f32)
    h2 = jnp.maximum(h2 + b2_ref[...], 0.0)                           # [G,T,32]

    # x.view(B,-1) on [B,32,T] (channel-major) + Linear(dense_dim,256)+ReLU as
    # ONE batched matmul; the flatten permutation is pre-folded into wl1's
    # layout [256, T*32] (column = t*32 + channel).
    h2f = jnp.concatenate([h2[:, t:t + 1, :] for t in range(t_len)],
                          axis=-1)                                    # [G,1,T*32]
    wl1b = jnp.broadcast_to(wl1_ref[...], (g,) + tuple(wl1_ref.shape))  # [G,256,T*32]
    h3 = jnp.einsum('gzc,goc->gzo', h2f, wl1b, preferred_element_type=f32)
    h3 = jnp.maximum(h3 + bl1_ref[...], 0.0)                          # [G,1,256]

    # F.dropout(p=0.5, training=False) is the identity; Linear(256, out).
    wl2b = jnp.broadcast_to(wl2_ref[...], (g,) + tuple(wl2_ref.shape))  # [G,out,256]
    o_ref[...] = (jnp.einsum('gzc,goc->gzo', h3, wl2b,
                             preferred_element_type=f32) + bl2_ref[...])


def head_fused(x_even, x_odd, w1, b1, w2f, b2, wl1k, bl1, wl2k, bl2, *, kw2):
    bsz, half, d = x_even.shape
    t_len = half - kw2 + 1
    out_f = wl2k.shape[0]
    g_blk = bsz if bsz <= 8 else 8            # graphs per grid step

    kern = functools.partial(_head_kernel, kw2=kw2, t_len=t_len)
    flops = bsz * (2 * (2 * half * d * 16) + 2 * t_len * (kw2 * 16) * 32
                   + 2 * (t_len * 32) * 256 + 2 * 256 * out_f)
    bytes_accessed = 4 * (2 * bsz * half * d + bsz * out_f + 512) \
        + 4 * (w1.size + b1.size + w2f.size + b2.size
               + wl1k.size + bl1.size + wl2k.size + bl2.size)

    out = pl.pallas_call(
        kern,
        grid=(pl.cdiv(bsz, g_blk),),
        in_specs=[
            pl.BlockSpec((g_blk, half, d), lambda b: (b, 0, 0)),
            pl.BlockSpec((g_blk, half, d), lambda b: (b, 0, 0)),
            _full_spec(w1.shape), _full_spec(b1.shape),
            _full_spec(w2f.shape), _full_spec(b2.shape),
            _full_spec(wl1k.shape), _full_spec(bl1.shape),
            _full_spec(wl2k.shape), _full_spec(bl2.shape),
        ],
        out_specs=pl.BlockSpec((g_blk, 1, out_f), lambda b: (b, 0, 0)),
        out_shape=jax.ShapeDtypeStruct((bsz, 1, out_f), jnp.float32),
        compiler_params=pltpu.CompilerParams(
            dimension_semantics=("parallel",)),   # 2 TCs split the batch blocks
        cost_estimate=pl.CostEstimate(flops=int(flops), transcendentals=0,
                                      bytes_accessed=int(bytes_accessed)),
    )(x_even, x_odd, w1, b1, w2f, b2, wl1k, bl1, wl2k, bl2)
    return out.reshape(bsz, out_f)


# --------------------------------- forward ---------------------------------

def dgcnn_forward(params, x, edge_index, batch, num_graphs, k):
    N = x.shape[0]
    src, dst = edge_index[0], edge_index[1]

    # Dense A^T[source, target] = 1 (scatter has no Pallas equivalent).  The
    # kernel consumes A^T so the GCN runs in transposed ([F, N]) layout; bf16 is
    # lossless for adjacency entries {0, 1, 2} (duplicate edges accumulate).
    adj_t = jnp.zeros((N, N), jnp.float32).at[src, dst].add(1.0)
    adj_t = adj_t.astype(jnp.bfloat16)

    # ---- kernel 1: fused GCN stack -> single [D_total, N] slab ----
    slab_t = gcn_stack(adj_t, jnp.transpose(x), params["gcn"])
    xcat = jnp.transpose(slab_t)                              # [N, D_total]
    D = xcat.shape[-1]

    # ---- global_sort_pool(xcat, batch, k) ----
    # TODO(synk): per-graph argsort/top-k has no Pallas TPU primitive; plain JAX.
    fill = xcat.min() - 1.0
    counts = jnp.bincount(batch, length=num_graphs)
    offs = jnp.concatenate(
        [jnp.zeros((1,), jnp.int32), jnp.cumsum(counts)[:-1].astype(jnp.int32)])
    pos = jnp.arange(N, dtype=jnp.int32) - offs[batch]
    dense = jnp.full((num_graphs, N, D), fill, jnp.float32)
    dense = dense.at[batch, pos].set(xcat)
    order = jnp.argsort(-dense[:, :, -1], axis=1)             # descending by last channel
    dense = jnp.take_along_axis(dense, order[:, :, None], axis=1)
    if N >= k:
        dense = dense[:, :k]
    else:
        pad = jnp.full((num_graphs, k - N, D), fill, jnp.float32)
        dense = jnp.concatenate([dense, pad], axis=1)
    dense = jnp.where(dense == fill, 0.0, dense)              # [B, k, D]

    # ---- kernel 2: fused head ----
    # MaxPool1d(2,2) pairs node rows (2h, 2h+1); an odd trailing row is dropped,
    # exactly like PyTorch (handles odd k).
    half = k // 2
    x_even = dense[:, 0:2 * half:2, :]                        # [B, k//2, D]
    x_odd = dense[:, 1:2 * half:2, :]
    kw2 = params["w2f"].shape[1] // params["b1"].shape[1]     # conv2 kernel width
    assert half - kw2 + 1 >= 1, "k too small for conv2"

    return head_fused(x_even, x_odd, params["w1"], params["b1"],
                      params["w2f"], params["b2"],
                      params["wl1k"], params["bl1"],
                      params["wl2k"], params["bl2"], kw2=kw2)


# ----------------------------------- main -----------------------------------

if __name__ == "__main__":
    hidden_channels, num_features, num_layers, out_features, k = 8, 4, 3, 6, 10
    n_per_graph = [12, 12]
    num_graphs = len(n_per_graph)
    N = sum(n_per_graph)

    key = jax.random.PRNGKey(0)
    keys = jax.random.split(key, 16)

    # --- deterministic synthetic graph (two 12-node rings) ---
    x = jax.random.normal(keys[0], (N, num_features), jnp.float32)
    edges = []
    off = 0
    for n in n_per_graph:
        for i in range(n):
            j = (i + 1) % n
            edges.append((off + i, off + j))
            edges.append((off + j, off + i))
        off += n
    edge_index = jnp.array(edges, dtype=jnp.int32).T                    # [2, E]
    batch = jnp.concatenate(
        [jnp.full((gn,), g, jnp.int32) for g, gn in enumerate(n_per_graph)])

    # --- deterministic parameters (shapes from the module's __init__) ---
    def glorot(kk, shape):
        s = (6.0 / (shape[0] + shape[1])) ** 0.5
        return jax.random.uniform(kk, shape, jnp.float32, -s, s)

    gcn_dims = ([(num_features, hidden_channels)]
                + [(hidden_channels, hidden_channels)] * (num_layers - 1)
                + [(hidden_channels, 1)])
    gcn_params = []
    kidx = 1
    for (fi, fo) in gcn_dims:
        w = glorot(keys[kidx], (fi, fo)); kidx += 1
        # kernel 1 consumes transposed weights [F_out, F_in] and biases [F_out, 1]
        gcn_params.append((jnp.transpose(w), jnp.zeros((fo, 1), jnp.float32)))

    total_latent_dim = hidden_channels * num_layers + 1                  # 25
    conv1d_kws = [total_latent_dim, 5]
    w1_t = jax.random.normal(keys[kidx], (16, 1, conv1d_kws[0]), jnp.float32) * 0.1; kidx += 1
    b1 = jax.random.normal(keys[kidx], (1, 16), jnp.float32) * 0.1; kidx += 1
    w2_t = jax.random.normal(keys[kidx], (32, 16, conv1d_kws[1]), jnp.float32) * 0.1; kidx += 1
    b2 = jax.random.normal(keys[kidx], (1, 32), jnp.float32) * 0.1; kidx += 1
    t_len = int((k - 2) / 2 + 1) - conv1d_kws[1] + 1                     # conv2 out length
    dense_dim = t_len * 32                                               # == module's dense_dim
    wl1_t = jax.random.normal(keys[kidx], (256, dense_dim), jnp.float32) * 0.1; kidx += 1
    bl1 = jax.random.normal(keys[kidx], (1, 256), jnp.float32) * 0.1; kidx += 1
    wl2_t = jax.random.normal(keys[kidx], (out_features, 256), jnp.float32) * 0.1; kidx += 1
    bl2 = jax.random.normal(keys[kidx], (1, out_features), jnp.float32) * 0.1; kidx += 1

    params = {
        "gcn": gcn_params,
        # Conv1d(1,16,D,stride=D): weight [16,1,D] -> [16, D] (contract on D)
        "w1": w1_t[:, 0, :],
        "b1": b1,
        # Conv1d(16,32,5,1): weight [32,16,5] -> [32, 5*16], column = tap*16+chan
        "w2f": jnp.transpose(w2_t, (0, 2, 1)).reshape(32, conv1d_kws[1] * 16),
        "b2": b2,
        # Linear(dense_dim,256): fold PyTorch's channel-major flatten (o*T+t)
        # into the kernel's tap-major layout (t*32+o): [256, T*32]
        "wl1k": jnp.transpose(wl1_t.reshape(256, 32, t_len),
                              (0, 2, 1)).reshape(256, t_len * 32),
        "bl1": bl1,
        # Linear(256,out): keep [out, 256]; the kernel contracts the 256 axis.
        "wl2k": wl2_t,
        "bl2": bl2,
    }

    out = dgcnn_forward(params, x, edge_index, batch, num_graphs, k)
    out = jax.block_until_ready(out)
    assert out.shape == (num_graphs, out_features), out.shape
    assert bool(jnp.all(jnp.isfinite(out)))
    print("KERNEL_OK")
</pallas_src>

<mosaic_0001>
module attributes {stable_mosaic.version = 11 : i64} {
  func.func @kernel(%arg0: memref<24x24xbf16, #tpu.memory_space<vmem>>, %arg1: memref<4x24xf32, #tpu.memory_space<vmem>>, %arg2: memref<8x4xf32, #tpu.memory_space<vmem>>, %arg3: memref<8x1xf32, #tpu.memory_space<vmem>>, %arg4: memref<8x8xf32, #tpu.memory_space<vmem>>, %arg5: memref<8x1xf32, #tpu.memory_space<vmem>>, %arg6: memref<8x8xf32, #tpu.memory_space<vmem>>, %arg7: memref<8x1xf32, #tpu.memory_space<vmem>>, %arg8: memref<1x8xf32, #tpu.memory_space<vmem>>, %arg9: memref<1x1xf32, #tpu.memory_space<vmem>>, %arg10: memref<25x24xf32, #tpu.memory_space<vmem>>) attributes {dimension_semantics = [], scalar_prefetch = 0 : i64, scratch_operands = 0 : i64, tpu.core_type = #tpu.core_type<tc>} {
    %c0 = arith.constant 0 : index
    %c0_0 = arith.constant 0 : index
    %0 = vector.load %arg0[%c0, %c0_0] : memref<24x24xbf16, #tpu.memory_space<vmem>>, vector<24x24xbf16>
    %1 = arith.extf %0 : vector<24x24xbf16> to vector<24x24xf32>
    %cst = arith.constant dense<0.000000e+00> : vector<24xf32>
    %2 = vector.multi_reduction <add>, %1, %cst [0] : vector<24x24xf32> to vector<24xf32>
    %3 = vector.shape_cast %2 : vector<24xf32> to vector<1x24xf32>
    %cst_1 = arith.constant 1.000000e+00 : f32
    %4 = vector.broadcast %cst_1 : f32 to vector<1x24xf32>
    %5 = arith.addf %3, %4 : vector<1x24xf32>
    %6 = math.rsqrt %5 : vector<1x24xf32>
    %c0_2 = arith.constant 0 : index
    %c0_3 = arith.constant 0 : index
    %7 = vector.load %arg1[%c0_2, %c0_3] : memref<4x24xf32, #tpu.memory_space<vmem>>, vector<4x24xf32>
    %c0_4 = arith.constant 0 : index
    %c0_5 = arith.constant 0 : index
    %8 = vector.load %arg2[%c0_4, %c0_5] : memref<8x4xf32, #tpu.memory_space<vmem>>, vector<8x4xf32>
    %c0_6 = arith.constant 0 : index
    %c0_7 = arith.constant 0 : index
    %9 = vector.load %arg3[%c0_6, %c0_7] : memref<8x1xf32, #tpu.memory_space<vmem>>, vector<8x1xf32>
    %cst_8 = arith.constant dense<0.000000e+00> : vector<8x24xf32>
    %10 = tpu.matmul %8, %7, %cst_8 {dimension_numbers = #tpu.dot_dimension_numbers<[1], [0], [0], [1], [0, 0, 1, 1], [], []>} : vector<8x4xf32>, vector<4x24xf32>, vector<8x24xf32> -> vector<8x24xf32>
    %11 = vector.broadcast %6 : vector<1x24xf32> to vector<8x24xf32>
    %12 = arith.mulf %11, %10 : vector<8x24xf32>
    %13 = arith.truncf %12 : vector<8x24xf32> to vector<8x24xbf16>
    %cst_9 = arith.constant dense<0.000000e+00> : vector<8x24xf32>
    %14 = tpu.matmul %13, %0, %cst_9 {dimension_numbers = #tpu.dot_dimension_numbers<[1], [0], [0], [1], [0, 0, 1, 1], [], []>} : vector<8x24xbf16>, vector<24x24xbf16>, vector<8x24xf32> -> vector<8x24xf32>
    %15 = arith.addf %14, %12 : vector<8x24xf32>
    %16 = vector.broadcast %6 : vector<1x24xf32> to vector<8x24xf32>
    %17 = arith.mulf %16, %15 : vector<8x24xf32>
    %18 = vector.broadcast %9 : vector<8x1xf32> to vector<8x24xf32>
    %19 = arith.addf %17, %18 : vector<8x24xf32>
    %20 = math.tanh %19 : vector<8x24xf32>
    %c0_10 = arith.constant 0 : index
    %c0_11 = arith.constant 0 : index
    %21 = vector.load %arg10[%c0_10, %c0_11] : memref<25x24xf32, #tpu.memory_space<vmem>>, vector<8x24xf32>
    tpu.vector_store %arg10[%c0_10, %c0_11], %20 {strides = array<i32>} : memref<25x24xf32, #tpu.memory_space<vmem>>, vector<8x24xf32>,
    %c0_12 = arith.constant 0 : index
    %c0_13 = arith.constant 0 : index
    %22 = vector.load %arg4[%c0_12, %c0_13] : memref<8x8xf32, #tpu.memory_space<vmem>>, vector<8x8xf32>
    %c0_14 = arith.constant 0 : index
    %c0_15 = arith.constant 0 : index
    %23 = vector.load %arg5[%c0_14, %c0_15] : memref<8x1xf32, #tpu.memory_space<vmem>>, vector<8x1xf32>
    %cst_16 = arith.constant dense<0.000000e+00> : vector<8x24xf32>
    %24 = tpu.matmul %22, %20, %cst_16 {dimension_numbers = #tpu.dot_dimension_numbers<[1], [0], [0], [1], [0, 0, 1, 1], [], []>} : vector<8x8xf32>, vector<8x24xf32>, vector<8x24xf32> -> vector<8x24xf32>
    %25 = vector.broadcast %6 : vector<1x24xf32> to vector<8x24xf32>
    %26 = arith.mulf %25, %24 : vector<8x24xf32>
    %27 = arith.truncf %26 : vector<8x24xf32> to vector<8x24xbf16>
    %cst_17 = arith.constant dense<0.000000e+00> : vector<8x24xf32>
    %28 = tpu.matmul %27, %0, %cst_17 {dimension_numbers = #tpu.dot_dimension_numbers<[1], [0], [0], [1], [0, 0, 1, 1], [], []>} : vector<8x24xbf16>, vector<24x24xbf16>, vector<8x24xf32> -> vector<8x24xf32>
    %29 = arith.addf %28, %26 : vector<8x24xf32>
    %30 = vector.broadcast %6 : vector<1x24xf32> to vector<8x24xf32>
    %31 = arith.mulf %30, %29 : vector<8x24xf32>
    %32 = vector.broadcast %23 : vector<8x1xf32> to vector<8x24xf32>
    %33 = arith.addf %31, %32 : vector<8x24xf32>
    %34 = math.tanh %33 : vector<8x24xf32>
    %c8 = arith.constant 8 : index
    %c0_18 = arith.constant 0 : index
    %35 = vector.load %arg10[%c8, %c0_18] : memref<25x24xf32, #tpu.memory_space<vmem>>, vector<8x24xf32>
    tpu.vector_store %arg10[%c8, %c0_18], %34 {strides = array<i32>} : memref<25x24xf32, #tpu.memory_space<vmem>>, vector<8x24xf32>,
    %c0_19 = arith.constant 0 : index
    %c0_20 = arith.constant 0 : index
    %36 = vector.load %arg6[%c0_19, %c0_20] : memref<8x8xf32, #tpu.memory_space<vmem>>, vector<8x8xf32>
    %c0_21 = arith.constant 0 : index
    %c0_22 = arith.constant 0 : index
    %37 = vector.load %arg7[%c0_21, %c0_22] : memref<8x1xf32, #tpu.memory_space<vmem>>, vector<8x1xf32>
    %cst_23 = arith.constant dense<0.000000e+00> : vector<8x24xf32>
    %38 = tpu.matmul %36, %34, %cst_23 {dimension_numbers = #tpu.dot_dimension_numbers<[1], [0], [0], [1], [0, 0, 1, 1], [], []>} : vector<8x8xf32>, vector<8x24xf32>, vector<8x24xf32> -> vector<8x24xf32>
    %39 = vector.broadcast %6 : vector<1x24xf32> to vector<8x24xf32>
    %40 = arith.mulf %39, %38 : vector<8x24xf32>
    %41 = arith.truncf %40 : vector<8x24xf32> to vector<8x24xbf16>
    %cst_24 = arith.constant dense<0.000000e+00> : vector<8x24xf32>
    %42 = tpu.matmul %41, %0, %cst_24 {dimension_numbers = #tpu.dot_dimension_numbers<[1], [0], [0], [1], [0, 0, 1, 1], [], []>} : vector<8x24xbf16>, vector<24x24xbf16>, vector<8x24xf32> -> vector<8x24xf32>
    %43 = arith.addf %42, %40 : vector<8x24xf32>
    %44 = vector.broadcast %6 : vector<1x24xf32> to vector<8x24xf32>
    %45 = arith.mulf %44, %43 : vector<8x24xf32>
    %46 = vector.broadcast %37 : vector<8x1xf32> to vector<8x24xf32>
    %47 = arith.addf %45, %46 : vector<8x24xf32>
    %48 = math.tanh %47 : vector<8x24xf32>
    %c16 = arith.constant 16 : index
    %c0_25 = arith.constant 0 : index
    %49 = vector.load %arg10[%c16, %c0_25] : memref<25x24xf32, #tpu.memory_space<vmem>>, vector<8x24xf32>
    tpu.vector_store %arg10[%c16, %c0_25], %48 {strides = array<i32>} : memref<25x24xf32, #tpu.memory_space<vmem>>, vector<8x24xf32>,
    %c0_26 = arith.constant 0 : index
    %c0_27 = arith.constant 0 : index
    %50 = vector.load %arg8[%c0_26, %c0_27] : memref<1x8xf32, #tpu.memory_space<vmem>>, vector<1x8xf32>
    %c0_28 = arith.constant 0 : index
    %c0_29 = arith.constant 0 : index
    %51 = vector.load %arg9[%c0_28, %c0_29] : memref<1x1xf32, #tpu.memory_space<vmem>>, vector<1x1xf32>
    %cst_30 = arith.constant dense<0.000000e+00> : vector<1x24xf32>
    %52 = tpu.matmul %50, %48, %cst_30 {dimension_numbers = #tpu.dot_dimension_numbers<[1], [0], [0], [1], [0, 0, 1, 1], [], []>} : vector<1x8xf32>, vector<8x24xf32>, vector<1x24xf32> -> vector<1x24xf32>
    %53 = arith.mulf %6, %52 : vector<1x24xf32>
    %54 = arith.truncf %53 : vector<1x24xf32> to vector<1x24xbf16>
    %cst_31 = arith.constant dense<0.000000e+00> : vector<1x24xf32>
    %55 = tpu.matmul %54, %0, %cst_31 {dimension_numbers = #tpu.dot_dimension_numbers<[1], [0], [0], [1], [0, 0, 1, 1], [], []>} : vector<1x24xbf16>, vector<24x24xbf16>, vector<1x24xf32> -> vector<1x24xf32>
    %56 = arith.addf %55, %53 : vector<1x24xf32>
    %57 = arith.mulf %6, %56 : vector<1x24xf32>
    %58 = vector.broadcast %51 : vector<1x1xf32> to vector<1x24xf32>
    %59 = arith.addf %57, %58 : vector<1x24xf32>
    %60 = math.tanh %59 : vector<1x24xf32>
    %c24 = arith.constant 24 : index
    %c0_32 = arith.constant 0 : index
    %61 = vector.load %arg10[%c24, %c0_32] : memref<25x24xf32, #tpu.memory_space<vmem>>, vector<1x24xf32>
    tpu.vector_store %arg10[%c24, %c0_32], %60 {strides = array<i32>} : memref<25x24xf32, #tpu.memory_space<vmem>>, vector<1x24xf32>,
    return
  }
}

</mosaic_0001>

<bundles_post_ra>
// kernel: tpu_custom_call.1
= control target key start
LH: loop header
LB: loop body
LE: loop exit
PB: predicated region body
PF: predicated region fallthrough
CT: control target
= control target key end

     0   :  { %vm65_vm0 = vcmask 1043456   ;;  %v703_v0 = vmov 0.0   ;;  %vm704_vm1 = vmmov 0   ;;  %vm61_vm2 = vcmask 31744   ;;  %s871_s0 = inlined_call_operand.vmem [shape: bf16[24,24], index: 0, kind: input, shape index: {}]   ;;  %s872_s1 = inlined_call_operand.vmem [shape: f32[4,24], index: 1, kind: input, shape index: {}]   ;;  %s873_s2 = inlined_call_operand.vmem [shape: f32[8,4], index: 2, kind: input, shape index: {}]   ;;  %s874_s3 = inlined_call_operand.vmem [shape: f32[8,1], index: 3, kind: input, shape index: {}]   ;;  %s875_s5 = inlined_call_operand.vmem [shape: f32[8,1], index: 5, kind: input, shape index: {}]   ;;  %s876_s4 = inlined_call_operand.vmem [shape: f32[8,8], index: 4, kind: input, shape index: {}]   ;;  %s877_s10 = inlined_call_operand.vmem [shape: f32[25,24], index: 10, kind: output, shape index: {}]   ;;  %s878_s6 = inlined_call_operand.vmem [shape: f32[8,8], index: 6, kind: input, shape index: {}]   ;;  %s879_s7 = inlined_call_operand.vmem [shape: f32[8,1], index: 7, kind: input, shape index: {}]   ;;  %s880_s9 = inlined_call_operand.<no memory space> [shape: f32[1,1], index: 9, kind: input, shape index: {}]   ;;  %s881_s8 = inlined_call_operand.vmem [shape: f32[1,8], index: 8, kind: input, shape index: {}]  }
   0x1   :  { %633 = vmatprep.subr.mxu0 %v703_v0  ;;  %v40_v1 = vld [vmem:[%s871_s0 + $0x8] sm:$0xf]  ;;  %v58_v2 = vld [vmem:[%s872_s1] sm:$0xf]  ;;  %635 = vmatprep.mubr.msk.f32.mxu0 %vm704_vm1, %v703_v0  ;;  %v705_v7 = vmov 0   ;;  %vm44_vm3 = vcmask 195584   ;;  %v15_v55 = vstv %s880_s9 }
   0x2   :  { %634 = vmatpush3.msk.msra.mxu0 %vm65_vm0, %v58_v2  ;;  %v605_v3 = vcombine.low %v40_v1, %v40_v1  ;;  %v59_v4 = vld [vmem:[%s873_s2] sm:$0xff]  ;;  %638 = vmatprep.subr.bf16.mxu1 %v703_v0  ;;  %v43_v12 = vunpack.c.l.bf16 %v40_v1  ;;  %vm207_vm4 = vcmask 64512   ;;  %16 = vst [vmem:[#allocation2] sm:$0x1] %v15_v55  ;;  %vm596_vm5 = vcmask 188416  }
   0x3   :  { %636 = vmatmul.mubr.msk.f32.vlgmr.msra.gmra.mxu0 %vm61_vm2, %v59_v4  ;;  %642 = vmatprep.mubr.msk.bf16.mxu1 %vm704_vm1, %v703_v0  ;;  %v786_v6 = vld [vmem:[%s871_s0] sm:$0xff]  }
   0x4   :  { %v776_v5 = vsel %vm65_vm0, %v605_v3, 0  ;;  %646 = vmatprep.subr.mxu0 %v703_v0  ;;  %648 = vmatprep.mubr.msk.f32.mxu0 %vm704_vm1, %v703_v0  ;;  %v60_v8 = vld [vmem:[%s874_s3] sm:$0xff]  ;;  %v41_v10 = vunpack.c.l.bf16 %v786_v6  ;;  %v42_v11 = vunpack.c.h.bf16 %v786_v6  ;;  %v48_v16 = vsel %vm44_vm3, %v43_v12, 0.0 }
   0x5   :  { %639 = vmatpush3.bf16.msra.mxu1 %v776_v5  ;;  %688 = vset.pattern.permute.xlu0 %v705_v7  ;;  %v206_v9 = vld [vmem:[%s875_s5] sm:$0xff] }
   0x6   :  { %640 = vmatprep.subr.bf16.mxu1 %v703_v0  ;;  %689 = vset.pattern.permute.xlu1 %v705_v7  ;;  %v45_v13 = vsel %vm44_vm3, %v41_v10, 0.0  ;;  %v46_v14 = vsel %vm44_vm3, %v42_v11, 0.0  ;;  %v205_v38 = vld [vmem:[%s876_s4] sm:$0xff]  ;;  %v590_v11 = vlaneseq }
   0x7   :  { %199 = vperm.xlu0 %688, %v60_v8   ;;  %v47_v15 = vadd.f32 %v46_v14, %v45_v13  ;;  %v335_v52 = vld [vmem:[%s878_s6] sm:$0xff] }
   0x8   :  { %v336_v54 = vld [vmem:[%s879_s7] sm:$0xff]  ;;  %v591_v12 = vshrl.u32 %v590_v11, 7 }
   0x9   :  { %641 = vmatpush3.bf16.msra.mxu1 %v786_v6  ;;  %v49_v17 = vadd.f32 %v48_v16, %v47_v15  ;;  %458 = vperm.xlu1 %689, %v336_v54   ;;  %v465_v56 = vld [vmem:[#allocation2] sm:$0x1] }
   0xa   :  { %659 = vmatprep.subr.mxu1 %v703_v0  ;;  %v592_v13 = vsub.s32 0, %v591_v12 }
   0xb   :  { %329 = vperm.xlu0 %688, %v206_v9   ;;  %v50_v18 = vrot.slane %v49_v17, 4 }
   0xd   :  { %v51_v19 = vadd.f32 %v50_v18, %v49_v17  ;;  %587 = vperm.xlu1 %689, %v465_v56  }
   0xf   :  { %v52_v20 = vrot.slane %v51_v19, 2 }
  0x11   :  { %v53_v21 = vadd.f32 %v52_v20, %v51_v19 }
  0x13   :  { %v54_v22 = vrot.slane %v53_v21, 1 }
  0x15   :  { %v55_v23 = vadd.f32 %v54_v22, %v53_v21 }
  0x17   :  { %v56_v24 = vadd.f32 1.0, %v55_v23 }
  0x19   :  { %693 = vrsqrt.f32 %v56_v24 }
  0x26   :  { %v801_v25 = vpop.eup %693 }
  0x82   :  { %v200_v34 = vpop.permute.xlu0 %199 }
  0x84   :  { %v459_v2 = vpop.permute.xlu1 %458 }
  0x86   :  { %v330_v48 = vpop.permute.xlu0 %329 }
  0x88   :  { %v588_v14 = vpop.permute.xlu1 %587 }
  0x89   :  { %v593_v18 = vrot.slane %v588_v14, %v592_v13 }
  0xc3   :  { %v135_v26 = vpop.f32.mrf.mxu0 }
  0xc4   :  { %v139_v27 = vmul.f32 %v801_v25, %v135_v26 }
  0xc5   :  { %v637_v28 = vpop.f32.mrf.mxu0 }
  0xc6   :  { %v140_v29 = vpack.c.bf16 %v139_v27, %v139_v27 }
  0xc8   :  { %643 = vmatmul.mubr.msk.bf16.vlgmr.msra.gmra.mxu1 %vm44_vm3, %v140_v29 }
  0xc9   :  { %661 = vmatprep.mubr.msk.f32.mxu1 %vm704_vm1, %v703_v0 }
 0x188   :  { %v190_v30 = vpop.f32.mrf.mxu1 }
 0x189   :  { %v191_v31 = vadd.f32 %v190_v30, %v139_v27 }
 0x18a   :  { %v644_v32 = vpop.f32.mrf.mxu1 }
 0x18b   :  { %v196_v33 = vmul.f32 %v801_v25, %v191_v31 }
 0x18c   :  { %v193_v35 = vpop.f32.mrf.mxu1 }
 0x18d   :  { %v202_v36 = vadd.f32 %v200_v34, %v196_v33 }
 0x18e   :  { %v645_v37 = vpop.f32.mrf.mxu1 }
 0x18f   :  { %695 = vtanh.f32 %v202_v36 }
 0x19c   :  { %v696_v39 = vpop.eup %695 }
 0x19d   :  { %204 = vst.msk [vmem:[%s877_s10] sm:$0xff] %vm44_vm3, %v696_v39  ;;  %647 = vmatpush3.msra.mxu0 %v696_v39 }
 0x19e   :  { %649 = vmatmul.mubr.msk.f32.vlgmr.msra.gmra.mxu0 %vm207_vm4, %v205_v38  ;;  %651 = vmatprep.subr.bf16.mxu0 %v703_v0 }
 0x19f   :  { %652 = vmatpush3.bf16.msra.mxu0 %v776_v5  ;;  %655 = vmatprep.mubr.msk.bf16.mxu0 %vm704_vm1, %v703_v0 }
 0x1a0   :  { %653 = vmatprep.subr.bf16.mxu0 %v703_v0 }
 0x1a3   :  { %654 = vmatpush3.bf16.msra.mxu0 %v786_v6 }
 0x1a4   :  { %664 = vmatprep.subr.bf16.mxu0 %v703_v0 }
 0x25e   :  { %v277_v40 = vpop.f32.mrf.mxu0 }
 0x25f   :  { %v281_v41 = vmul.f32 %v801_v25, %v277_v40 }
 0x260   :  { %v650_v42 = vpop.f32.mrf.mxu0 }
 0x261   :  { %v282_v43 = vpack.c.bf16 %v281_v41, %v281_v41 }
 0x263   :  { %656 = vmatmul.mubr.msk.bf16.vlgmr.msra.gmra.mxu0 %vm44_vm3, %v282_v43 }
 0x264   :  { %665 = vmatpush3.bf16.msra.mxu0 %v776_v5  ;;  %668 = vmatprep.mubr.msk.bf16.mxu0 %vm704_vm1, %v703_v0 }
 0x265   :  { %666 = vmatprep.subr.bf16.mxu0 %v703_v0 }
 0x268   :  { %667 = vmatpush3.bf16.msra.mxu0 %v786_v6 }
 0x269   :  { %672 = vmatprep.subr.mxu0 %v703_v0 }
 0x323   :  { %v320_v44 = vpop.f32.mrf.mxu0 }
 0x324   :  { %v321_v45 = vadd.f32 %v320_v44, %v281_v41 }
 0x325   :  { %v657_v46 = vpop.f32.mrf.mxu0 }
 0x326   :  { %v326_v47 = vmul.f32 %v801_v25, %v321_v45 }
 0x327   :  { %v323_v49 = vpop.f32.mrf.mxu0 }
 0x328   :  { %v332_v50 = vadd.f32 %v330_v48, %v326_v47 }
 0x329   :  { %v658_v51 = vpop.f32.mrf.mxu0 }
 0x32a   :  { %697 = vtanh.f32 %v332_v50 }
 0x337   :  { %v698_v53 = vpop.eup %697 }
 0x338   :  { %334 = vst.msk [vmem:[%s877_s10 + $0x8] sm:$0xff] %vm44_vm3, %v698_v53  ;;  %660 = vmatpush3.msra.mxu1 %v698_v53 }
 0x339   :  { %662 = vmatmul.mubr.msk.f32.vlgmr.msra.gmra.mxu1 %vm207_vm4, %v335_v52  ;;  %677 = vmatprep.subr.bf16.mxu1 %v703_v0 }
 0x33a   :  { %678 = vmatpush3.bf16.msra.mxu1 %v776_v5  ;;  %681 = vmatprep.mubr.msk.bf16.mxu1 %vm704_vm1, %v703_v0 }
 0x33b   :  { %679 = vmatprep.subr.bf16.mxu1 %v703_v0 }
 0x33e   :  { %680 = vmatpush3.bf16.msra.mxu1 %v786_v6  ;;  %v464_v6 = vld [vmem:[%s881_s8] sm:$0x1] }
 0x3f9   :  { %v406_v57 = vpop.f32.mrf.mxu1 }
 0x3fa   :  { %v410_v58 = vmul.f32 %v801_v25, %v406_v57 }
 0x3fb   :  { %v663_v59 = vpop.f32.mrf.mxu1 }
 0x3fc   :  { %v411_v60 = vpack.c.bf16 %v410_v58, %v410_v58 }
 0x3fe   :  { %669 = vmatmul.mubr.msk.bf16.vlgmr.msra.gmra.mxu0 %vm44_vm3, %v411_v60 }
 0x3ff   :  { %674 = vmatprep.mubr.msk.f32.mxu0 %vm704_vm1, %v703_v0 }
 0x4be   :  { %v449_v61 = vpop.f32.mrf.mxu0 }
 0x4bf   :  { %v450_v62 = vadd.f32 %v449_v61, %v410_v58 }
 0x4c0   :  { %v670_v63 = vpop.f32.mrf.mxu0 }
 0x4c1   :  { %v455_v1 = vmul.f32 %v801_v25, %v450_v62 }
 0x4c2   :  { %v452_v3 = vpop.f32.mrf.mxu0 }
 0x4c3   :  { %v461_v4 = vadd.f32 %v459_v2, %v455_v1 }
 0x4c4   :  { %v671_v5 = vpop.f32.mrf.mxu0 }
 0x4c5   :  { %699 = vtanh.f32 %v461_v4 }
 0x4d2   :  { %v700_v7 = vpop.eup %699 }
 0x4d3   :  { %463 = vst.msk [vmem:[%s877_s10 + $0x10] sm:$0xff] %vm44_vm3, %v700_v7  ;;  %673 = vmatpush3.msra.mxu0 %v700_v7 }
 0x4d4   :  { %675 = vmatmul.mubr.msk.f32.vlgmr.msra.gmra.mxu0 %vm207_vm4, %v464_v6 }
 0x594   :  { %v535_v0 = vpop.f32.mrf.mxu0 }
 0x595   :  { %v539_v8 = vmul.f32 %v801_v25, %v535_v0 }
 0x596   :  { %v676_v9 = vpop.f32.mrf.mxu0 }
 0x597   :  { %v540_v10 = vpack.c.bf16 %v539_v8, %v539_v8 }
 0x599   :  { %682 = vmatmul.mubr.msk.bf16.vlgmr.msra.gmra.mxu1 %vm44_vm3, %v540_v10 }
 0x659   :  { %v578_v15 = vpop.f32.mrf.mxu1 }
 0x65a   :  { %v579_v16 = vadd.f32 %v578_v15, %v539_v8 }
 0x65b   :  { %v683_v17 = vpop.f32.mrf.mxu1 }
 0x65c   :  { %v584_v19 = vmul.f32 %v801_v25, %v579_v16 }
 0x65d   :  { %v581_v20 = vpop.f32.mrf.mxu1 }
 0x65e   :  { %v594_v21 = vadd.f32 %v593_v18, %v584_v19 }
 0x65f   :  { %v684_v22 = vpop.f32.mrf.mxu1 }
 0x660   :  { %701 = vtanh.f32 %v594_v21 }
 0x66d   :  { %v702_v23 = vpop.eup %701 }
 0x66e   :  { %597 = vst.msk [vmem:[%s877_s10 + $0x18] sm:$0x1] %vm596_vm5, %v702_v23 }

</bundles_post_ra>
